<compile_context>
chip_gen: v6e
topology: v6e:2x2x1
jax: 0.10.0
libtpu: 0.0.40
codegen_flags: <defaults>
</compile_context>

<pallas_src>
import functools

import jax
import jax.numpy as jnp
from jax.experimental import pallas as pl
from jax.experimental.pallas import tpu as pltpu

N_INPUTS = 18
N_HIDDEN = 64
N_ACTIONS = 12


def _round_up(x, m):
    return (x + m - 1) // m * m


def mlp_kernel(x_ref, w1_ref, b1_ref, w2_ref, b2_ref, w3_ref, b3_ref, o_ref):
    # One (blk, 18) row-block of x; three small matmuls with f32 MXU
    # accumulation; biases and tanh in f32.  Non-tile-aligned contraction /
    # output dims (18, 64, 12) are handled by Mosaic's implicit tile padding.
    cdt = w1_ref.dtype
    x = x_ref[...].astype(cdt)                                        # (blk, 18)
    h = jnp.tanh(
        jnp.dot(x, w1_ref[...], preferred_element_type=jnp.float32) + b1_ref[...]
    )                                                                 # (blk, 64) f32
    h = jnp.tanh(
        jnp.dot(h.astype(cdt), w2_ref[...], preferred_element_type=jnp.float32)
        + b2_ref[...]
    )                                                                 # (blk, 64) f32
    h = jnp.tanh(
        jnp.dot(h.astype(cdt), w3_ref[...], preferred_element_type=jnp.float32)
        + b3_ref[...]
    )                                                                 # (blk, 12) f32
    o_ref[...] = h.astype(o_ref.dtype)


def prepare_params(params, compute_dtype=jnp.float32):
    """Cast weights to the compute dtype (f32 exact, bf16 for v5e / large batch).

    Weights are stored (in_features, out_features); biases stay (1, out) f32.
    No shape padding is done -- the kernel handles the natural 18/64/12 dims.
    """
    w1, b1, w2, b2, w3, b3 = params
    return (
        w1.astype(compute_dtype), b1.astype(jnp.float32),
        w2.astype(compute_dtype), b2.astype(jnp.float32),
        w3.astype(compute_dtype), b3.astype(jnp.float32),
    )


def _choose_block(batch, block_b):
    """Pick a row-block size (multiple of 8) and the padded batch size.

    Caps the block so that the batch grid has >= 2 steps whenever the batch is
    large enough -- this lets the "parallel" grid axis shard across both
    TensorCores on v7x (no-op on single-TC v5e/v6e)."""
    b8 = _round_up(batch, 8)
    blk = min(_round_up(block_b, 8), b8)
    if b8 > 8 and blk >= b8:
        blk = _round_up((b8 + 1) // 2, 8)
    b_pad = _round_up(batch, blk)
    return blk, b_pad


@functools.partial(jax.jit, static_argnames=("block_b",))
def pytorch_mlp_forward(x, prepared_params, *, block_b=2048):
    """x: (B, N_INPUTS) float32.  Returns (B, N_ACTIONS) float32."""
    w1, b1, w2, b2, w3, b3 = prepared_params
    compute_dtype = w1.dtype
    B = x.shape[0]

    blk, b_pad = _choose_block(B, block_b)
    grid = (b_pad // blk,)

    # Only pad rows (and only when needed); columns are streamed at width 18.
    if b_pad != B:
        x = jnp.pad(x, ((0, b_pad - B), (0, 0)))

    x_itemsize = jnp.dtype(x.dtype).itemsize
    w_itemsize = jnp.dtype(compute_dtype).itemsize
    n_w = N_INPUTS * N_HIDDEN + N_HIDDEN * N_HIDDEN + N_HIDDEN * N_ACTIONS
    cost = pl.CostEstimate(
        flops=2 * b_pad * n_w,
        transcendentals=b_pad * (N_HIDDEN + N_HIDDEN + N_ACTIONS),
        bytes_accessed=(
            b_pad * N_INPUTS * x_itemsize          # x stream in
            + b_pad * N_ACTIONS * 4                # out stream
            + n_w * w_itemsize                     # weights (VMEM-resident)
            + (N_HIDDEN + N_HIDDEN + N_ACTIONS) * 4  # biases
        ),
    )

    out = pl.pallas_call(
        mlp_kernel,
        out_shape=jax.ShapeDtypeStruct((b_pad, N_ACTIONS), jnp.float32),
        grid_spec=pltpu.PrefetchScalarGridSpec(
            num_scalar_prefetch=0,
            grid=grid,
            in_specs=[
                # x: one (blk, 18) row-block per step (pipelined/double-buffered).
                pl.BlockSpec((blk, N_INPUTS), lambda i: (i, 0)),
                # Weights & biases: constant index_map -> stay VMEM-resident.
                pl.BlockSpec((N_INPUTS, N_HIDDEN), lambda i: (0, 0)),
                pl.BlockSpec((1, N_HIDDEN), lambda i: (0, 0)),
                pl.BlockSpec((N_HIDDEN, N_HIDDEN), lambda i: (0, 0)),
                pl.BlockSpec((1, N_HIDDEN), lambda i: (0, 0)),
                pl.BlockSpec((N_HIDDEN, N_ACTIONS), lambda i: (0, 0)),
                pl.BlockSpec((1, N_ACTIONS), lambda i: (0, 0)),
            ],
            out_specs=pl.BlockSpec((blk, N_ACTIONS), lambda i: (i, 0)),
        ),
        compiler_params=pltpu.CompilerParams(
            dimension_semantics=("parallel",),  # shards batch grid across TCs on v7x
        ),
        cost_estimate=cost,
    )(x, w1, b1, w2, b2, w3, b3)

    # Strip the row padding only (columns are already exactly N_ACTIONS wide).
    return out[:B] if b_pad != B else out


def init_params(key):
    """PyTorch-style init: U(-1/sqrt(fan_in), 1/sqrt(fan_in)).
    Weights stored as (in_features, out_features); biases as (1, out_features)."""
    def linear(key, fan_in, fan_out):
        kw, kb = jax.random.split(key)
        bound = 1.0 / jnp.sqrt(fan_in)
        w = jax.random.uniform(kw, (fan_in, fan_out), jnp.float32, -bound, bound)
        b = jax.random.uniform(kb, (1, fan_out), jnp.float32, -bound, bound)
        return w, b

    k1, k2, k3 = jax.random.split(key, 3)
    w1, b1 = linear(k1, N_INPUTS, N_HIDDEN)
    w2, b2 = linear(k2, N_HIDDEN, N_HIDDEN)
    w3, b3 = linear(k3, N_HIDDEN, N_ACTIONS)
    return (w1, b1, w2, b2, w3, b3)


def reference_forward(x, params):
    w1, b1, w2, b2, w3, b3 = params
    h = jnp.tanh(x @ w1 + b1)
    h = jnp.tanh(h @ w2 + b2)
    return jnp.tanh(h @ w3 + b3)


if __name__ == "__main__":
    key = jax.random.PRNGKey(0)
    k_x, k_p = jax.random.split(key)

    B = 2
    x = jax.random.normal(k_x, (B, N_INPUTS), jnp.float32)
    params = init_params(k_p)
    ref = reference_forward(x, params)

    # f32 path: exact (within MXU f32 tolerance) vs. the reference.
    params_f32 = prepare_params(params, jnp.float32)
    out = jax.block_until_ready(pytorch_mlp_forward(x, params_f32))
    assert out.shape == (B, N_ACTIONS), out.shape
    assert jnp.allclose(out, ref, atol=1e-5, rtol=1e-5), (
        f"max err {jnp.max(jnp.abs(out - ref))}"
    )

    # bf16 weight/compute path (v5e default / large-batch mode on v6e+v7x).
    # Note: activations between layers are also rounded to bf16, not just the
    # weights -> looser tolerance.
    params_bf16 = prepare_params(params, jnp.bfloat16)
    out_bf16 = jax.block_until_ready(pytorch_mlp_forward(x, params_bf16))
    assert out_bf16.shape == (B, N_ACTIONS), out_bf16.shape
    assert jnp.allclose(out_bf16, ref, atol=2e-2, rtol=2e-2), (
        f"bf16 max err {jnp.max(jnp.abs(out_bf16 - ref))}"
    )

    print("KERNEL_OK")
</pallas_src>

<mosaic_0001>
module attributes {stable_mosaic.version = 11 : i64} {
  func.func @mlp_kernel(%arg0: i32, %arg1: memref<8x18xf32, #tpu.memory_space<vmem>>, %arg2: memref<18x64xf32, #tpu.memory_space<vmem>>, %arg3: memref<1x64xf32, #tpu.memory_space<vmem>>, %arg4: memref<64x64xf32, #tpu.memory_space<vmem>>, %arg5: memref<1x64xf32, #tpu.memory_space<vmem>>, %arg6: memref<64x12xf32, #tpu.memory_space<vmem>>, %arg7: memref<1x12xf32, #tpu.memory_space<vmem>>, %arg8: memref<8x12xf32, #tpu.memory_space<vmem>>) attributes {dimension_semantics = [#tpu.dimension_semantics<parallel>], iteration_bounds = array<i64: 1>, scalar_prefetch = 0 : i64, scratch_operands = 0 : i64, tpu.core_type = #tpu.core_type<tc>, window_params = [{transform_indices = @transform_0, window_bounds = array<i64: 8, 18>}, {pipeline_mode = #tpu.pipeline_mode<synchronous>, transform_indices = @transform_1, window_bounds = array<i64: 18, 64>}, {pipeline_mode = #tpu.pipeline_mode<synchronous>, transform_indices = @transform_2, window_bounds = array<i64: 1, 64>}, {pipeline_mode = #tpu.pipeline_mode<synchronous>, transform_indices = @transform_3, window_bounds = array<i64: 64, 64>}, {pipeline_mode = #tpu.pipeline_mode<synchronous>, transform_indices = @transform_4, window_bounds = array<i64: 1, 64>}, {pipeline_mode = #tpu.pipeline_mode<synchronous>, transform_indices = @transform_5, window_bounds = array<i64: 64, 12>}, {pipeline_mode = #tpu.pipeline_mode<synchronous>, transform_indices = @transform_6, window_bounds = array<i64: 1, 12>}, {transform_indices = @transform_7, window_bounds = array<i64: 8, 12>}]} {
    %c0 = arith.constant 0 : index
    %c0_0 = arith.constant 0 : index
    %0 = vector.load %arg1[%c0, %c0_0] : memref<8x18xf32, #tpu.memory_space<vmem>>, vector<8x18xf32>
    %c0_1 = arith.constant 0 : index
    %c0_2 = arith.constant 0 : index
    %1 = vector.load %arg2[%c0_1, %c0_2] : memref<18x64xf32, #tpu.memory_space<vmem>>, vector<18x64xf32>
    %cst = arith.constant dense<0.000000e+00> : vector<8x64xf32>
    %2 = tpu.matmul %0, %1, %cst {dimension_numbers = #tpu.dot_dimension_numbers<[1], [0], [0], [1], [0, 0, 1, 1], [], []>} : vector<8x18xf32>, vector<18x64xf32>, vector<8x64xf32> -> vector<8x64xf32>
    %c0_3 = arith.constant 0 : index
    %c0_4 = arith.constant 0 : index
    %3 = vector.load %arg3[%c0_3, %c0_4] : memref<1x64xf32, #tpu.memory_space<vmem>>, vector<1x64xf32>
    %4 = vector.broadcast %3 : vector<1x64xf32> to vector<8x64xf32>
    %5 = arith.addf %2, %4 : vector<8x64xf32>
    %6 = math.tanh %5 : vector<8x64xf32>
    %c0_5 = arith.constant 0 : index
    %c0_6 = arith.constant 0 : index
    %7 = vector.load %arg4[%c0_5, %c0_6] : memref<64x64xf32, #tpu.memory_space<vmem>>, vector<64x64xf32>
    %cst_7 = arith.constant dense<0.000000e+00> : vector<8x64xf32>
    %8 = tpu.matmul %6, %7, %cst_7 {dimension_numbers = #tpu.dot_dimension_numbers<[1], [0], [0], [1], [0, 0, 1, 1], [], []>} : vector<8x64xf32>, vector<64x64xf32>, vector<8x64xf32> -> vector<8x64xf32>
    %c0_8 = arith.constant 0 : index
    %c0_9 = arith.constant 0 : index
    %9 = vector.load %arg5[%c0_8, %c0_9] : memref<1x64xf32, #tpu.memory_space<vmem>>, vector<1x64xf32>
    %10 = vector.broadcast %9 : vector<1x64xf32> to vector<8x64xf32>
    %11 = arith.addf %8, %10 : vector<8x64xf32>
    %12 = math.tanh %11 : vector<8x64xf32>
    %c0_10 = arith.constant 0 : index
    %c0_11 = arith.constant 0 : index
    %13 = vector.load %arg6[%c0_10, %c0_11] : memref<64x12xf32, #tpu.memory_space<vmem>>, vector<64x12xf32>
    %cst_12 = arith.constant dense<0.000000e+00> : vector<8x12xf32>
    %14 = tpu.matmul %12, %13, %cst_12 {dimension_numbers = #tpu.dot_dimension_numbers<[1], [0], [0], [1], [0, 0, 1, 1], [], []>} : vector<8x64xf32>, vector<64x12xf32>, vector<8x12xf32> -> vector<8x12xf32>
    %c0_13 = arith.constant 0 : index
    %c0_14 = arith.constant 0 : index
    %15 = vector.load %arg7[%c0_13, %c0_14] : memref<1x12xf32, #tpu.memory_space<vmem>>, vector<1x12xf32>
    %16 = vector.broadcast %15 : vector<1x12xf32> to vector<8x12xf32>
    %17 = arith.addf %14, %16 : vector<8x12xf32>
    %18 = math.tanh %17 : vector<8x12xf32>
    %c0_15 = arith.constant 0 : index
    %c0_16 = arith.constant 0 : index
    %19 = vector.load %arg8[%c0_15, %c0_16] : memref<8x12xf32, #tpu.memory_space<vmem>>, vector<8x12xf32>
    tpu.vector_store %arg8[%c0_15, %c0_16], %18 {strides = array<i32>} : memref<8x12xf32, #tpu.memory_space<vmem>>, vector<8x12xf32>,
    return
  }
  func.func @transform_0(%arg0: i32) -> (i32, i32) {
    %c0_i32 = arith.constant 0 : i32
    %c0_i32_0 = arith.constant 0 : i32
    return %arg0, %c0_i32 : i32, i32
  }
  func.func @transform_1(%arg0: i32) -> (i32, i32) {
    %c0_i32 = arith.constant 0 : i32
    %c0_i32_0 = arith.constant 0 : i32
    %c0_i32_1 = arith.constant 0 : i32
    return %c0_i32, %c0_i32_0 : i32, i32
  }
  func.func @transform_2(%arg0: i32) -> (i32, i32) {
    %c0_i32 = arith.constant 0 : i32
    %c0_i32_0 = arith.constant 0 : i32
    %c0_i32_1 = arith.constant 0 : i32
    return %c0_i32, %c0_i32_0 : i32, i32
  }
  func.func @transform_3(%arg0: i32) -> (i32, i32) {
    %c0_i32 = arith.constant 0 : i32
    %c0_i32_0 = arith.constant 0 : i32
    %c0_i32_1 = arith.constant 0 : i32
    return %c0_i32, %c0_i32_0 : i32, i32
  }
  func.func @transform_4(%arg0: i32) -> (i32, i32) {
    %c0_i32 = arith.constant 0 : i32
    %c0_i32_0 = arith.constant 0 : i32
    %c0_i32_1 = arith.constant 0 : i32
    return %c0_i32, %c0_i32_0 : i32, i32
  }
  func.func @transform_5(%arg0: i32) -> (i32, i32) {
    %c0_i32 = arith.constant 0 : i32
    %c0_i32_0 = arith.constant 0 : i32
    %c0_i32_1 = arith.constant 0 : i32
    return %c0_i32, %c0_i32_0 : i32, i32
  }
  func.func @transform_6(%arg0: i32) -> (i32, i32) {
    %c0_i32 = arith.constant 0 : i32
    %c0_i32_0 = arith.constant 0 : i32
    %c0_i32_1 = arith.constant 0 : i32
    return %c0_i32, %c0_i32_0 : i32, i32
  }
  func.func @transform_7(%arg0: i32) -> (i32, i32) {
    %c0_i32 = arith.constant 0 : i32
    %c0_i32_0 = arith.constant 0 : i32
    return %arg0, %c0_i32 : i32, i32
  }
}

</mosaic_0001>

<bundles_post_ra>
// kernel: pytorch_mlp_forward.1
= control target key start
LH: loop header
LB: loop body
LE: loop exit
PB: predicated region body
PF: predicated region fallthrough
CT: control target
= control target key end

     0   :  { %vm41_vm0 = vcmask 1041408   ;;  %v385_v0 = vmov 0.0   ;;  %vm386_vm1 = vmmov 0   ;;  %vm37_vm2 = vcmask 146432   ;;  %s523_s1 = inlined_call_operand.vmem [shape: f32[18,64], index: 1, kind: input, shape index: {}]   ;;  %s524_s0 = inlined_call_operand.vmem [shape: f32[8,18], index: 0, kind: input, shape index: {}]   ;;  %s525_s3 = inlined_call_operand.vmem [shape: f32[64,64], index: 3, kind: input, shape index: {}]   ;;  %s526_s2 = inlined_call_operand.vmem [shape: f32[1,64], index: 2, kind: input, shape index: {}]   ;;  %s527_s5 = inlined_call_operand.vmem [shape: f32[64,12], index: 5, kind: input, shape index: {}]   ;;  %s528_s4 = inlined_call_operand.vmem [shape: f32[1,64], index: 4, kind: input, shape index: {}]   ;;  %s529_s6 = inlined_call_operand.vmem [shape: f32[1,12], index: 6, kind: input, shape index: {}]   ;;  %s530_s7 = inlined_call_operand.vmem [shape: f32[8,12], index: 7, kind: output, shape index: {}]  }
   0x1   :  { %330 = vmatprep.subr.mxu0 %v385_v0  ;;  %v29_v1 = vld [vmem:[%s523_s1 + $0x10] sm:$0x3]  ;;  %v28_v2 = vld [vmem:[%s523_s1 + $0x8] sm:$0xff]  ;;  %336 = vmatprep.mubr.msk.f32.mxu0 %vm386_vm1, %v385_v0  ;;  %v27_v3 = vld [vmem:[%s523_s1] sm:$0xff]  ;;  %vm131_vm3 = vcmask 523264   ;;  %vm295_vm4 = vcmask 97280  }
   0x2   :  { %331 = vmatpush3.msk.msra.mxu0 %vm41_vm0, %v29_v1  ;;  %339 = vmatprep.subr.mxu1 %v385_v0  ;;  %v26_v4 = vld [vmem:[%s524_s0] sm:$0xff]  ;;  %v123_v5 = vld [vmem:[%s525_s3 + $0x38] sm:$0xff]  ;;  %v122_v6 = vld [vmem:[%s525_s3 + $0x30] sm:$0xff] }
   0x3   :  { %332 = vmatprep.subr.mxu0 %v385_v0  ;;  %355 = vmatprep.mubr.msk.f32.mxu1 %vm386_vm1, %v385_v0  ;;  %v121_v7 = vld [vmem:[%s525_s3 + $0x28] sm:$0xff]  ;;  %v120_v8 = vld [vmem:[%s525_s3 + $0x20] sm:$0xff]  ;;  %v119_v9 = vld [vmem:[%s525_s3 + $0x18] sm:$0xff] }
   0x4   :  { %333 = vmatpush3.msra.mxu0 %v28_v2  ;;  %340 = vmatpush3.msra.mxu1 %v123_v5  ;;  %v118_v10 = vld [vmem:[%s525_s3 + $0x10] sm:$0xff]  ;;  %v117_v11 = vld [vmem:[%s525_s3 + $0x8] sm:$0xff]  ;;  %v116_v12 = vld [vmem:[%s525_s3] sm:$0xff] }
   0x5   :  { %334 = vmatprep.subr.mxu0 %v385_v0  ;;  %341 = vmatprep.subr.mxu1 %v385_v0  ;;  %v301_v13 = vld [vmem:[%s526_s2] ss:$0 sm:$0xff]  ;;  %v213_v18 = vld [vmem:[%s527_s5 + $0x38] sm:$0xff]  ;;  %v212_v19 = vld [vmem:[%s527_s5 + $0x30] sm:$0xff] }
   0x6   :  { %335 = vmatpush3.msra.mxu0 %v27_v3  ;;  %342 = vmatpush3.msra.mxu1 %v122_v6  ;;  %v211_v20 = vld [vmem:[%s527_s5 + $0x28] sm:$0xff]  ;;  %v210_v21 = vld [vmem:[%s527_s5 + $0x20] sm:$0xff]  ;;  %v209_v22 = vld [vmem:[%s527_s5 + $0x18] sm:$0xff] }
   0x7   :  { %337 = vmatmul.mubr.msk.f32.vlgmr.msra.gmra.mxu0 %vm37_vm2, %v26_v4  ;;  %358 = vmatprep.subr.mxu0 %v385_v0  ;;  %v208_v23 = vld [vmem:[%s527_s5 + $0x10] sm:$0xff]  ;;  %v207_v24 = vld [vmem:[%s527_s5 + $0x8] sm:$0xff]  ;;  %v206_v25 = vld [vmem:[%s527_s5] sm:$0xff] }
   0x8   :  { %374 = vmatprep.mubr.msk.f32.mxu0 %vm386_vm1, %v385_v0  ;;  %343 = vmatprep.subr.mxu1 %v385_v0  ;;  %v304_v26 = vld [vmem:[%s528_s4] ss:$0 sm:$0xff] }
   0x9   :  { %344 = vmatpush3.msra.mxu1 %v121_v7  ;;  %359 = vmatpush3.msra.mxu0 %v213_v18  ;;  %v306_v31 = vld [vmem:[%s529_s6] ss:$0 sm:$0xff] }
   0xa   :  { %345 = vmatprep.subr.mxu1 %v385_v0  ;;  %360 = vmatprep.subr.mxu0 %v385_v0 }
   0xb   :  { %346 = vmatpush3.msra.mxu1 %v120_v8  ;;  %361 = vmatpush3.msra.mxu0 %v212_v19 }
   0xc   :  { %347 = vmatprep.subr.mxu1 %v385_v0  ;;  %362 = vmatprep.subr.mxu0 %v385_v0 }
   0xd   :  { %348 = vmatpush3.msra.mxu1 %v119_v9  ;;  %363 = vmatpush3.msra.mxu0 %v211_v20 }
   0xe   :  { %349 = vmatprep.subr.mxu1 %v385_v0  ;;  %364 = vmatprep.subr.mxu0 %v385_v0 }
   0xf   :  { %350 = vmatpush3.msra.mxu1 %v118_v10  ;;  %365 = vmatpush3.msra.mxu0 %v210_v21 }
  0x10   :  { %351 = vmatprep.subr.mxu1 %v385_v0  ;;  %366 = vmatprep.subr.mxu0 %v385_v0 }
  0x11   :  { %352 = vmatpush3.msra.mxu1 %v117_v11  ;;  %367 = vmatpush3.msra.mxu0 %v209_v22 }
  0x12   :  { %353 = vmatprep.subr.mxu1 %v385_v0  ;;  %368 = vmatprep.subr.mxu0 %v385_v0 }
  0x13   :  { %354 = vmatpush3.msra.mxu1 %v116_v12  ;;  %369 = vmatpush3.msra.mxu0 %v208_v23 }
  0x14   :  { %370 = vmatprep.subr.mxu0 %v385_v0 }
  0x15   :  { %371 = vmatpush3.msra.mxu0 %v207_v24 }
  0x16   :  { %372 = vmatprep.subr.mxu0 %v385_v0 }
  0x17   :  { %373 = vmatpush3.msra.mxu0 %v206_v25 }
  0xc7   :  { %v111_v14 = vpop.f32.mrf.mxu0 }
  0xc8   :  { %v112_v15 = vadd.f32 %v301_v13, %v111_v14 }
  0xc9   :  { %v338_v16 = vpop.f32.mrf.mxu0 }
  0xca   :  { %379 = vtanh.f32 %v112_v15 }
  0xd7   :  { %v380_v17 = vpop.eup %379 }
  0xd8   :  { %356 = vmatmul.mubr.msk.f32.vlgmr.msra.gmra.mxu1 %vm131_vm3, %v380_v17 }
 0x198   :  { %v201_v27 = vpop.f32.mrf.mxu1 }
 0x199   :  { %v202_v28 = vadd.f32 %v304_v26, %v201_v27 }
 0x19a   :  { %v357_v29 = vpop.f32.mrf.mxu1 }
 0x19b   :  { %381 = vtanh.f32 %v202_v28 }
 0x1a8   :  { %v382_v30 = vpop.eup %381 }
 0x1a9   :  { %375 = vmatmul.mubr.msk.f32.vlgmr.msra.gmra.mxu0 %vm131_vm3, %v382_v30 }
 0x269   :  { %v290_v32 = vpop.f32.mrf.mxu0 }
 0x26a   :  { %v291_v33 = vadd.f32 %v306_v31, %v290_v32 }
 0x26b   :  { %v376_v34 = vpop.f32.mrf.mxu0 }
 0x26c   :  { %383 = vtanh.f32 %v291_v33 }
 0x279   :  { %v384_v35 = vpop.eup %383 }
 0x27a   :  { %296 = vst.msk [vmem:[%s530_s7] sm:$0xff] %vm295_vm4, %v384_v35 }

</bundles_post_ra>
